<compile_context>
chip_gen: v7x
topology: tpu7x:2x2x1
jax: 0.10.0
libtpu: 0.0.40
codegen_flags: <defaults>
</compile_context>

<pallas_src>
import functools

import jax
import jax.numpy as jnp
from jax import lax
from jax.experimental import pallas as pl
from jax.experimental.pallas import tpu as pltpu


def _round_up(x, m):
    return ((x + m - 1) // m) * m


def _gen_loss_kernel(*refs, lambda_consistency, lambda_diversity,
                     lambda_confidence, lambda_smoothness, temperature,
                     label_smoothing, use_clean, batch_real, row_block):
    # Trace-time branch: the clean-logits ref only exists when use_clean.
    if use_clean:
        (logits_hbm, features_hbm, labels_ref, clean_hbm,
         out_ref, fnorm_sc, probs_sc, acc) = refs
    else:
        (logits_hbm, features_hbm, labels_ref,
         out_ref, fnorm_sc, probs_sc, acc) = refs

    Bp, C = logits_hbm.shape
    D = features_hbm.shape[1]
    TB = row_block
    step = pl.program_id(0)

    # -------- step 0: DMA raw inputs into a scoped region + precompute ------
    @pl.when(step == 0)
    def _init():
        acc[3] = 0.0   # sum over ALL (i,j) of fsim_ij^2
        acc[5] = 0.0   # sum over ALL (i,j) of (fsim_ij - psim_ij)^2
        acc[6] = 0.0   # sum_i fsim_ii^2 (MXU diagonal, matches reference mask)

        def _precompute(*scoped):
            if use_clean:
                lg_buf, ft_buf, lc_buf, sems = scoped
            else:
                lg_buf, ft_buf, sems = scoped
            copies = [pltpu.make_async_copy(logits_hbm, lg_buf, sems.at[0]),
                      pltpu.make_async_copy(features_hbm, ft_buf, sems.at[1])]
            if use_clean:
                copies.append(pltpu.make_async_copy(clean_hbm, lc_buf, sems.at[2]))
            for cp in copies:
                cp.start()
            for cp in copies:
                cp.wait()

            logits = lg_buf[...].astype(jnp.float32)          # (Bp, C)
            feats = ft_buf[...].astype(jnp.float32)           # (Bp, D)
            labels = labels_ref[...]                          # (Bp, 1) int32

            rows = lax.broadcasted_iota(jnp.int32, (Bp, 1), 0)
            valid = (rows < batch_real).astype(jnp.float32)   # padded-row mask
            ids = lax.broadcasted_iota(jnp.int32, (Bp, C), 1)
            onehot = (ids == labels).astype(jnp.float32)

            # softmax / log-softmax, exp() computed once.
            m = jnp.max(logits, axis=1, keepdims=True)
            shifted = logits - m
            exp_s = jnp.exp(shifted)
            sum_e = jnp.sum(exp_s, axis=1, keepdims=True)
            log_probs = shifted - jnp.log(sum_e)
            inv_sum = 1.0 / sum_e        # exact divide (probs feed the check)
            probs_sc[...] = (exp_s * inv_sum) * valid   # zero padded rows

            # label smoothing + soft-target cross entropy
            fill = label_smoothing / (C - 1)
            smoothed = fill + (1.0 - label_smoothing - fill) * onehot
            acc[1] = -jnp.sum(valid * smoothed * log_probs) / batch_real

            # confidence calibration: row max prob is exp(0)/sum_e = inv_sum.
            max_probs = inv_sum
            pred = jnp.min(jnp.where(logits == m, ids, C), axis=1, keepdims=True)
            correct = (pred == labels).astype(jnp.float32)
            conf = correct * (max_probs - 0.8) ** 2 \
                 + (1.0 - correct) * max_probs ** 2
            acc[4] = jnp.sum(valid * conf) / batch_real

            # L2-normalized features; padded rows forced to zero.
            nrm = jnp.sqrt(jnp.sum(feats * feats, axis=1, keepdims=True))
            fnorm_sc[...] = (feats / jnp.maximum(nrm, 1e-12)) * valid

            if use_clean:
                T = temperature
                # max(logits/T) == m/T  -> reuse `shifted` for the tempered pass.
                st = shifted * (1.0 / T)
                logp_t = st - jnp.log(jnp.sum(jnp.exp(st), axis=1, keepdims=True))
                ltc = lc_buf[...].astype(jnp.float32) * (1.0 / T)
                mtc = jnp.max(ltc, axis=1, keepdims=True)
                stc = ltc - mtc
                exp_c = jnp.exp(stc)
                sum_c = jnp.sum(exp_c, axis=1, keepdims=True)
                logp_c = stc - jnp.log(sum_c)
                p_c = exp_c / sum_c
                # F.kl_div(logp_t, p_c, reduction='batchmean') * T**2
                acc[2] = (jnp.sum(valid * p_c * (logp_c - logp_t))
                          / batch_real) * (T * T)
            else:
                acc[2] = 0.0

        scoped = [pltpu.VMEM(logits_hbm.shape, logits_hbm.dtype),
                  pltpu.VMEM(features_hbm.shape, features_hbm.dtype)]
        if use_clean:
            scoped.append(pltpu.VMEM(clean_hbm.shape, clean_hbm.dtype))
        scoped.append(pltpu.SemaphoreType.DMA((3 if use_clean else 2,)))
        pl.run_scoped(_precompute, *scoped)

    # -------- every step: symmetric gram blocks for row stripe `step` -------
    r0 = pl.multiple_of(step * TB, TB)
    fnb = fnorm_sc[pl.ds(r0, TB), :]                           # (TB, D)
    pnb = probs_sc[pl.ds(r0, TB), :]                           # (TB, C)
    dn = (((1,), (1,)), ((), ()))                              # x @ y.T form

    # diagonal block (i, i): counted once, supplies the gram diagonal.
    fsim_d = lax.dot_general(fnb, fnb, dn, preferred_element_type=jnp.float32)
    psim_d = lax.dot_general(pnb, pnb, dn, preferred_element_type=jnp.float32)
    diff_d = fsim_d - psim_d
    rr = lax.broadcasted_iota(jnp.int32, (TB, TB), 0)
    cc = lax.broadcasted_iota(jnp.int32, (TB, TB), 1)
    diag_d = jnp.where(rr == cc, fsim_d, 0.0)
    acc[3] = acc[3] + jnp.sum(fsim_d * fsim_d)
    acc[5] = acc[5] + jnp.sum(diff_d * diff_d)
    acc[6] = acc[6] + jnp.sum(diag_d * diag_d)

    # strictly-lower blocks (i, j<i): grams are symmetric -> count twice.
    @pl.loop(0, step)
    def _offdiag(j):
        c0 = pl.multiple_of(j * TB, TB)
        fblk = fnorm_sc[pl.ds(c0, TB), :]                      # (TB, D)
        pblk = probs_sc[pl.ds(c0, TB), :]                      # (TB, C)
        fsim_b = lax.dot_general(fnb, fblk, dn,
                                 preferred_element_type=jnp.float32)
        psim_b = lax.dot_general(pnb, pblk, dn,
                                 preferred_element_type=jnp.float32)
        diff_b = fsim_b - psim_b
        acc[3] = acc[3] + 2.0 * jnp.sum(fsim_b * fsim_b)
        acc[5] = acc[5] + 2.0 * jnp.sum(diff_b * diff_b)

    # -------- last step: finalize scalars ------------------------------------
    @pl.when(step == pl.num_programs(0) - 1)
    def _finalize():
        ce = acc[1]
        cons = acc[2]
        conf = acc[4]
        denom_div = float(batch_real * (batch_real - 1)) if batch_real > 1 else 1.0
        div = (acc[3] - acc[6]) / denom_div
        smooth = acc[5] / float(batch_real * batch_real)
        out_ref[0] = (ce
                      + lambda_consistency * cons
                      + lambda_diversity * div
                      + lambda_confidence * conf
                      + lambda_smoothness * smooth)
        out_ref[1] = ce
        out_ref[2] = cons
        out_ref[3] = div
        out_ref[4] = conf
        out_ref[5] = smooth
        out_ref[6] = 0.0
        out_ref[7] = 0.0


def generalization_loss(logits, features, labels, logits_clean=None, *,
                        lambda_consistency=0.3, lambda_diversity=0.2,
                        lambda_confidence=0.1, lambda_smoothness=0.15,
                        temperature=3.0, label_smoothing=0.1,
                        row_block=None):
    """JAX/Pallas port of GeneralizationLoss.forward. Returns (total, details)."""
    B, C = logits.shape
    D = features.shape[1]
    use_clean = (logits_clean is not None) and (lambda_consistency > 0)

    # Row block: 256 for big batches (v6e-friendly, also a 128 multiple for
    # v5e), otherwise the batch rounded up to a multiple of 8 (single stripe).
    if row_block is None:
        row_block = 256 if B >= 256 else _round_up(B, 8)
    TB = _round_up(int(row_block), 8)
    Bp = _round_up(B, TB)
    n_steps = Bp // TB

    pad = Bp - B
    if pad:
        logits = jnp.pad(logits, ((0, pad), (0, 0)))
        features = jnp.pad(features, ((0, pad), (0, 0)))
        labels = jnp.pad(labels, ((0, pad),))
        if use_clean:
            logits_clean = jnp.pad(logits_clean, ((0, pad), (0, 0)))
    labels2d = labels.astype(jnp.int32).reshape(Bp, 1)

    kernel = functools.partial(
        _gen_loss_kernel,
        lambda_consistency=float(lambda_consistency),
        lambda_diversity=float(lambda_diversity),
        lambda_confidence=float(lambda_confidence),
        lambda_smoothness=float(lambda_smoothness),
        temperature=float(temperature),
        label_smoothing=float(label_smoothing),
        use_clean=use_clean, batch_real=B, row_block=TB)

    # VMEM budget: resident f32 scratch + step-0 scoped input copies + step-0
    # f32 temporaries + per-step stripes/blocks, with ~50% headroom, clamped
    # to ~90% of physical VMEM.
    in_bytes = jnp.dtype(logits.dtype).itemsize
    ft_bytes = jnp.dtype(features.dtype).itemsize
    est = (Bp * D * 4 + Bp * C * 4                                 # scratch
           + Bp * C * in_bytes * (2 if use_clean else 1)           # scoped logits
           + Bp * D * ft_bytes                                     # scoped feats
           + 6 * Bp * C * 4 + 3 * Bp * D * 4                       # step-0 temps
           + 2 * TB * (C + D) * 4 + 6 * TB * TB * 4                # per-step temps
           + 4 * Bp * 4)
    try:
        cap = int(pltpu.get_tpu_info().vmem_capacity_bytes)
    except Exception:
        cap = 64 * 1024 * 1024
    vmem_limit = int(min(int(cap * 0.9), max(32 * 1024 * 1024, int(est * 1.5))))

    vmem = pltpu.MemorySpace.VMEM
    in_specs = [
        pl.BlockSpec(memory_space=pl.ANY),      # logits: stays in HBM, DMA'd once
        pl.BlockSpec(memory_space=pl.ANY),      # features
        pl.BlockSpec((Bp, 1), lambda i: (0, 0), memory_space=vmem),  # labels
    ]
    inputs = [logits, features, labels2d]
    if use_clean:
        in_specs.append(pl.BlockSpec(memory_space=pl.ANY))           # clean logits
        inputs.append(logits_clean)

    out = pl.pallas_call(
        kernel,
        out_shape=jax.ShapeDtypeStruct((8,), jnp.float32),
        grid=(n_steps,),
        in_specs=in_specs,
        out_specs=pl.BlockSpec((8,), lambda i: (0,),
                               memory_space=pltpu.MemorySpace.SMEM),
        scratch_shapes=[
            pltpu.VMEM((Bp, D), jnp.float32),   # normalized features (resident)
            pltpu.VMEM((Bp, C), jnp.float32),   # softmax probs (resident)
            pltpu.SMEM((8,), jnp.float32),      # scalar accumulators
        ],
        compiler_params=pltpu.CompilerParams(
            dimension_semantics=("arbitrary",),   # sequential accumulation
            vmem_limit_bytes=vmem_limit),
    )(*inputs)

    details = {
        'ce_loss': out[1],
        'diversity_loss': out[3],
        'confidence_loss': out[4],
        'smoothness_loss': out[5],
    }
    if use_clean:
        details['consistency_loss'] = out[2]
    return out[0], details


def _reference(logits, features, labels, logits_clean=None, *,
               lc=0.3, ld=0.2, lcf=0.1, ls=0.15, T=3.0, smooth=0.1):
    """Pure-JAX reference mirroring the PyTorch forward (for sanity check)."""
    B, C = logits.shape
    onehot = jax.nn.one_hot(labels, C, dtype=jnp.float32)
    target = smooth / (C - 1) * (1 - onehot) + (1 - smooth) * onehot
    logp = jax.nn.log_softmax(logits, axis=1)
    ce = -jnp.mean(jnp.sum(target * logp, axis=1))
    total = ce

    if logits_clean is not None and lc > 0:
        logp_t = jax.nn.log_softmax(logits / T, axis=1)
        p_c = jax.nn.softmax(logits_clean / T, axis=1)
        cons = jnp.sum(p_c * (jnp.log(p_c) - logp_t)) / B * T * T
        total = total + lc * cons

    fn = features / jnp.maximum(
        jnp.linalg.norm(features, axis=1, keepdims=True), 1e-12)
    fsim = fn @ fn.T
    mask = jnp.eye(B, dtype=bool)
    div = jnp.sum(jnp.where(mask, 0.0, fsim) ** 2) / (B * B - B)

    probs = jax.nn.softmax(logits, axis=1)
    mp = jnp.max(probs, axis=1)
    correct = (jnp.argmax(logits, axis=1) == labels).astype(jnp.float32)
    conf = jnp.mean(correct * (mp - 0.8) ** 2) + jnp.mean((1 - correct) * mp ** 2)

    psim = probs @ probs.T
    sm = jnp.mean((fsim - psim) ** 2)
    return total + ld * div + lcf * conf + ls * sm


if __name__ == "__main__":
    key = jax.random.PRNGKey(0)
    k1, k2, k3, k4 = jax.random.split(key, 4)

    B, C, D = 8, 16, 32
    logits = jax.random.normal(k1, (B, C), dtype=jnp.float32)
    logits_clean = logits + 0.05 * jax.random.normal(k2, (B, C), dtype=jnp.float32)
    features = jax.random.normal(k3, (B, D), dtype=jnp.float32)
    labels = jax.random.randint(k4, (B,), 0, C, dtype=jnp.int32)

    # 1) single stripe, with the consistency (clean-logits) branch compiled in
    total, details = generalization_loss(logits, features, labels, logits_clean)
    total = jax.block_until_ready(total)
    ref = _reference(logits, features, labels, logits_clean)
    assert jnp.allclose(total, ref, rtol=1e-4, atol=1e-5), (total, ref)

    # 2) multi-stripe grid: exercises the symmetric off-diagonal block loop
    kk = jax.random.split(key, 8)
    B2 = 16
    logits2 = jax.random.normal(kk[4], (B2, C), dtype=jnp.float32)
    clean2 = logits2 + 0.05 * jax.random.normal(kk[5], (B2, C), dtype=jnp.float32)
    feats2 = jax.random.normal(kk[6], (B2, D), dtype=jnp.float32)
    labels2 = jax.random.randint(kk[7], (B2,), 0, C, dtype=jnp.int32)
    total2, _ = generalization_loss(logits2, feats2, labels2, clean2, row_block=8)
    total2 = jax.block_until_ready(total2)
    ref2 = _reference(logits2, feats2, labels2, clean2)
    assert jnp.allclose(total2, ref2, rtol=1e-4, atol=1e-5), (total2, ref2)

    # 3) non-multiple-of-8 batch: exercises batch padding + row masking, no clean
    B3 = 12
    logits3 = jax.random.normal(kk[1], (B3, C), dtype=jnp.float32)
    feats3 = jax.random.normal(kk[2], (B3, D), dtype=jnp.float32)
    labels3 = jax.random.randint(kk[3], (B3,), 0, C, dtype=jnp.int32)
    total3, _ = generalization_loss(logits3, feats3, labels3, None)
    total3 = jax.block_until_ready(total3)
    ref3 = _reference(logits3, feats3, labels3, None)
    assert jnp.allclose(total3, ref3, rtol=1e-4, atol=1e-5), (total3, ref3)

    print("KERNEL_OK")
</pallas_src>

<mosaic_0001>
module attributes {stable_mosaic.version = 11 : i64} {
  func.func @_gen_loss_kernel(%arg0: i32, %arg1: memref<8x16xf32, #tpu.memory_space<any>>, %arg2: memref<8x32xf32, #tpu.memory_space<any>>, %arg3: memref<8x1xi32, #tpu.memory_space<vmem>>, %arg4: memref<8x16xf32, #tpu.memory_space<any>>, %arg5: memref<8xf32, #tpu.memory_space<smem>>, %arg6: memref<8x32xf32, #tpu.memory_space<vmem>>, %arg7: memref<8x16xf32, #tpu.memory_space<vmem>>, %arg8: memref<8xf32, #tpu.memory_space<smem>>) attributes {dimension_semantics = [#tpu.dimension_semantics<arbitrary>], iteration_bounds = array<i64: 1>, scalar_prefetch = 0 : i64, scratch_operands = 3 : i64, tpu.core_type = #tpu.core_type<tc>, window_params = [{}, {}, {pipeline_mode = #tpu.pipeline_mode<synchronous>, transform_indices = @transform_2, window_bounds = array<i64: 8, 1>}, {}, {transform_indices = @transform_4, window_bounds = array<i64: 8>}]} {
    %c0_i32 = arith.constant 0 : i32
    %0 = arith.cmpi eq, %arg0, %c0_i32 : i32
    %1 = arith.extui %0 : i1 to i32
    %c0_i32_0 = arith.constant 0 : i32
    %2 = arith.cmpi ne, %1, %c0_i32_0 : i32
    scf.if %2 {
      %cst_19 = arith.constant 0.000000e+00 : f32
      %c3_20 = arith.constant 3 : index
      %50 = memref.load %arg8[%c3_20] : memref<8xf32, #tpu.memory_space<smem>>
      memref.store %cst_19, %arg8[%c3_20] : memref<8xf32, #tpu.memory_space<smem>>
      %cst_21 = arith.constant 0.000000e+00 : f32
      %c5_22 = arith.constant 5 : index
      %51 = memref.load %arg8[%c5_22] : memref<8xf32, #tpu.memory_space<smem>>
      memref.store %cst_21, %arg8[%c5_22] : memref<8xf32, #tpu.memory_space<smem>>
      %cst_23 = arith.constant 0.000000e+00 : f32
      %c6_24 = arith.constant 6 : index
      %52 = memref.load %arg8[%c6_24] : memref<8xf32, #tpu.memory_space<smem>>
      memref.store %cst_23, %arg8[%c6_24] : memref<8xf32, #tpu.memory_space<smem>>
      "tpu.region"() ({
        %alloca = memref.alloca() : memref<8x16xf32, #tpu.memory_space<vmem>>
        %alloca_25 = memref.alloca() : memref<8x32xf32, #tpu.memory_space<vmem>>
        %alloca_26 = memref.alloca() : memref<8x16xf32, #tpu.memory_space<vmem>>
        %53 = tpu.sem_alloc : memref<3x!tpu.dma_semaphore, #tpu.memory_space<semaphore_mem>>
        %c0_i32_27 = arith.constant 0 : i32
        %54 = tpu.memref_slice %53[%c0_i32_27] : memref<3x!tpu.dma_semaphore, #tpu.memory_space<semaphore_mem>> -> memref<1x!tpu.dma_semaphore, #tpu.memory_space<semaphore_mem>>
        %55 = tpu.memref_squeeze %54 : memref<1x!tpu.dma_semaphore, #tpu.memory_space<semaphore_mem>> -> memref<!tpu.dma_semaphore, #tpu.memory_space<semaphore_mem>>
        tpu.enqueue_dma source(%arg1 : memref<8x16xf32, #tpu.memory_space<any>>) target(%alloca : memref<8x16xf32, #tpu.memory_space<vmem>>) target_semaphore(%55 : memref<!tpu.dma_semaphore, #tpu.memory_space<semaphore_mem>>)
        %c1_i32_28 = arith.constant 1 : i32
        %56 = tpu.memref_slice %53[%c1_i32_28] : memref<3x!tpu.dma_semaphore, #tpu.memory_space<semaphore_mem>> -> memref<1x!tpu.dma_semaphore, #tpu.memory_space<semaphore_mem>>
        %57 = tpu.memref_squeeze %56 : memref<1x!tpu.dma_semaphore, #tpu.memory_space<semaphore_mem>> -> memref<!tpu.dma_semaphore, #tpu.memory_space<semaphore_mem>>
        tpu.enqueue_dma source(%arg2 : memref<8x32xf32, #tpu.memory_space<any>>) target(%alloca_25 : memref<8x32xf32, #tpu.memory_space<vmem>>) target_semaphore(%57 : memref<!tpu.dma_semaphore, #tpu.memory_space<semaphore_mem>>)
        %c2_i32 = arith.constant 2 : i32
        %58 = tpu.memref_slice %53[%c2_i32] : memref<3x!tpu.dma_semaphore, #tpu.memory_space<semaphore_mem>> -> memref<1x!tpu.dma_semaphore, #tpu.memory_space<semaphore_mem>>
        %59 = tpu.memref_squeeze %58 : memref<1x!tpu.dma_semaphore, #tpu.memory_space<semaphore_mem>> -> memref<!tpu.dma_semaphore, #tpu.memory_space<semaphore_mem>>
        tpu.enqueue_dma source(%arg4 : memref<8x16xf32, #tpu.memory_space<any>>) target(%alloca_26 : memref<8x16xf32, #tpu.memory_space<vmem>>) target_semaphore(%59 : memref<!tpu.dma_semaphore, #tpu.memory_space<semaphore_mem>>)
        %c0_i32_29 = arith.constant 0 : i32
        %60 = tpu.memref_slice %53[%c0_i32_29] : memref<3x!tpu.dma_semaphore, #tpu.memory_space<semaphore_mem>> -> memref<1x!tpu.dma_semaphore, #tpu.memory_space<semaphore_mem>>
        %61 = tpu.memref_squeeze %60 : memref<1x!tpu.dma_semaphore, #tpu.memory_space<semaphore_mem>> -> memref<!tpu.dma_semaphore, #tpu.memory_space<semaphore_mem>>
        tpu.wait_dma2 semaphore(%61 : memref<!tpu.dma_semaphore, #tpu.memory_space<semaphore_mem>>) src(%arg1 : memref<8x16xf32, #tpu.memory_space<any>>) dst(%alloca : memref<8x16xf32, #tpu.memory_space<vmem>>)
        %c1_i32_30 = arith.constant 1 : i32
        %62 = tpu.memref_slice %53[%c1_i32_30] : memref<3x!tpu.dma_semaphore, #tpu.memory_space<semaphore_mem>> -> memref<1x!tpu.dma_semaphore, #tpu.memory_space<semaphore_mem>>
        %63 = tpu.memref_squeeze %62 : memref<1x!tpu.dma_semaphore, #tpu.memory_space<semaphore_mem>> -> memref<!tpu.dma_semaphore, #tpu.memory_space<semaphore_mem>>
        tpu.wait_dma2 semaphore(%63 : memref<!tpu.dma_semaphore, #tpu.memory_space<semaphore_mem>>) src(%arg2 : memref<8x32xf32, #tpu.memory_space<any>>) dst(%alloca_25 : memref<8x32xf32, #tpu.memory_space<vmem>>)
        %c2_i32_31 = arith.constant 2 : i32
        %64 = tpu.memref_slice %53[%c2_i32_31] : memref<3x!tpu.dma_semaphore, #tpu.memory_space<semaphore_mem>> -> memref<1x!tpu.dma_semaphore, #tpu.memory_space<semaphore_mem>>
        %65 = tpu.memref_squeeze %64 : memref<1x!tpu.dma_semaphore, #tpu.memory_space<semaphore_mem>> -> memref<!tpu.dma_semaphore, #tpu.memory_space<semaphore_mem>>
        tpu.wait_dma2 semaphore(%65 : memref<!tpu.dma_semaphore, #tpu.memory_space<semaphore_mem>>) src(%arg4 : memref<8x16xf32, #tpu.memory_space<any>>) dst(%alloca_26 : memref<8x16xf32, #tpu.memory_space<vmem>>)
        %c0_32 = arith.constant 0 : index
        %c0_33 = arith.constant 0 : index
        %66 = vector.load %alloca[%c0_32, %c0_33] : memref<8x16xf32, #tpu.memory_space<vmem>>, vector<8x16xf32>
        %c0_34 = arith.constant 0 : index
        %c0_35 = arith.constant 0 : index
        %67 = vector.load %alloca_25[%c0_34, %c0_35] : memref<8x32xf32, #tpu.memory_space<vmem>>, vector<8x32xf32>
        %c0_36 = arith.constant 0 : index
        %c0_37 = arith.constant 0 : index
        %68 = vector.load %arg3[%c0_36, %c0_37] : memref<8x1xi32, #tpu.memory_space<vmem>>, vector<8x1xi32>
        %69 = tpu.iota {dimensions = array<i32: 0>} : vector<8x1xi32>
        %c8_i32_38 = arith.constant 8 : i32
        %70 = vector.broadcast %c8_i32_38 : i32 to vector<8x1xi32>
        %71 = arith.cmpi slt, %69, %70 : vector<8x1xi32>
        %72 = arith.extui %71 : vector<8x1xi1> to vector<8x1xi32>
        %73 = arith.sitofp %72 : vector<8x1xi32> to vector<8x1xf32>
        %74 = tpu.iota {dimensions = array<i32: 1>} : vector<8x16xi32>
        %75 = vector.broadcast %68 : vector<8x1xi32> to vector<8x16xi32>
        %76 = arith.cmpi eq, %74, %75 : vector<8x16xi32>
        %77 = arith.extui %76 : vector<8x16xi1> to vector<8x16xi32>
        %78 = arith.sitofp %77 : vector<8x16xi32> to vector<8x16xf32>
        %cst_39 = arith.constant dense<0xFF800000> : vector<8xf32>
        %79 = vector.multi_reduction <maximumf>, %66, %cst_39 [1] : vector<8x16xf32> to vector<8xf32>
        %80 = vector.shape_cast %79 : vector<8xf32> to vector<8x1xf32>
        %81 = vector.broadcast %80 : vector<8x1xf32> to vector<8x16xf32>
        %82 = arith.subf %66, %81 : vector<8x16xf32>
        %83 = math.exp %82 : vector<8x16xf32>
        %cst_40 = arith.constant dense<0.000000e+00> : vector<8xf32>
        %84 = vector.multi_reduction <add>, %83, %cst_40 [1] : vector<8x16xf32> to vector<8xf32>
        %85 = vector.shape_cast %84 : vector<8xf32> to vector<8x1xf32>
        %86 = math.log %85 : vector<8x1xf32>
        %87 = vector.broadcast %86 : vector<8x1xf32> to vector<8x16xf32>
        %88 = arith.subf %82, %87 : vector<8x16xf32>
        %cst_41 = arith.constant 1.000000e+00 : f32
        %89 = vector.broadcast %cst_41 : f32 to vector<8x1xf32>
        %90 = arith.divf %89, %85 : vector<8x1xf32>
        %91 = vector.broadcast %90 : vector<8x1xf32> to vector<8x16xf32>
        %92 = arith.mulf %83, %91 : vector<8x16xf32>
        %93 = vector.broadcast %73 : vector<8x1xf32> to vector<8x16xf32>
        %94 = arith.mulf %92, %93 : vector<8x16xf32>
        %c0_42 = arith.constant 0 : index
        %c0_43 = arith.constant 0 : index
        %95 = vector.load %arg7[%c0_42, %c0_43] : memref<8x16xf32, #tpu.memory_space<vmem>>, vector<8x16xf32>
        tpu.vector_store %arg7[%c0_42, %c0_43], %94 {strides = array<i32>} : memref<8x16xf32, #tpu.memory_space<vmem>>, vector<8x16xf32>,
        %cst_44 = arith.constant 0.893333315 : f32
        %96 = vector.broadcast %cst_44 : f32 to vector<8x16xf32>
        %97 = arith.mulf %96, %78 : vector<8x16xf32>
        %cst_45 = arith.constant 0.00666666683 : f32
        %98 = vector.broadcast %cst_45 : f32 to vector<8x16xf32>
        %99 = arith.addf %98, %97 : vector<8x16xf32>
        %100 = vector.broadcast %73 : vector<8x1xf32> to vector<8x16xf32>
        %101 = arith.mulf %100, %99 : vector<8x16xf32>
        %102 = arith.mulf %101, %88 : vector<8x16xf32>
        %103 = vector.shape_cast %102 : vector<8x16xf32> to vector<1x8x16xf32>
        %cst_46 = arith.constant dense<0.000000e+00> : vector<1xf32>
        %104 = vector.multi_reduction <add>, %103, %cst_46 [1, 2] : vector<1x8x16xf32> to vector<1xf32>
        %105 = vector.shape_cast %104 : vector<1xf32> to vector<1x1x1xf32>
        %106 = vector.extract %105[0, 0, 0] : f32 from vector<1x1x1xf32>
        %cst_47 = arith.constant 0.000000e+00 : f32
        %107 = arith.subf %cst_47, %106 : f32
        %cst_48 = arith.constant 8.000000e+00 : f32
        %108 = arith.divf %107, %cst_48 : f32
        %c1 = arith.constant 1 : index
        %109 = memref.load %arg8[%c1] : memref<8xf32, #tpu.memory_space<smem>>
        memref.store %108, %arg8[%c1] : memref<8xf32, #tpu.memory_space<smem>>
        %110 = vector.broadcast %80 : vector<8x1xf32> to vector<8x16xf32>
        %111 = arith.cmpf oeq, %66, %110 : vector<8x16xf32>
        %c16_i32 = arith.constant 16 : i32
        %112 = vector.broadcast %c16_i32 : i32 to vector<8x16xi32>
        %113 = arith.select %111, %74, %112 : vector<8x16xi1>, vector<8x16xi32>
        %cst_49 = arith.constant dense<2147483647> : vector<8xi32>
        %114 = vector.multi_reduction <minsi>, %113, %cst_49 [1] : vector<8x16xi32> to vector<8xi32>
        %115 = vector.shape_cast %114 : vector<8xi32> to vector<8x1xi32>
        %116 = arith.cmpi eq, %115, %68 : vector<8x1xi32>
        %117 = arith.extui %116 : vector<8x1xi1> to vector<8x1xi32>
        %118 = arith.sitofp %117 : vector<8x1xi32> to vector<8x1xf32>
        %cst_50 = arith.constant 8.000000e-01 : f32
        %119 = vector.broadcast %cst_50 : f32 to vector<8x1xf32>
        %120 = arith.subf %90, %119 : vector<8x1xf32>
        %121 = arith.mulf %120, %120 : vector<8x1xf32>
        %122 = arith.mulf %118, %121 : vector<8x1xf32>
        %cst_51 = arith.constant 1.000000e+00 : f32
        %123 = vector.broadcast %cst_51 : f32 to vector<8x1xf32>
        %124 = arith.subf %123, %118 : vector<8x1xf32>
        %125 = arith.mulf %90, %90 : vector<8x1xf32>
        %126 = arith.mulf %124, %125 : vector<8x1xf32>
        %127 = arith.addf %122, %126 : vector<8x1xf32>
        %128 = arith.mulf %73, %127 : vector<8x1xf32>
        %129 = vector.shape_cast %128 : vector<8x1xf32> to vector<1x8x1xf32>
        %cst_52 = arith.constant dense<0.000000e+00> : vector<1xf32>
        %130 = vector.multi_reduction <add>, %129, %cst_52 [1, 2] : vector<1x8x1xf32> to vector<1xf32>
        %131 = vector.shape_cast %130 : vector<1xf32> to vector<1x1x1xf32>
        %132 = vector.extract %131[0, 0, 0] : f32 from vector<1x1x1xf32>
        %cst_53 = arith.constant 8.000000e+00 : f32
        %133 = arith.divf %132, %cst_53 : f32
        %c4 = arith.constant 4 : index
        %134 = memref.load %arg8[%c4] : memref<8xf32, #tpu.memory_space<smem>>
        memref.store %133, %arg8[%c4] : memref<8xf32, #tpu.memory_space<smem>>
        %135 = arith.mulf %67, %67 : vector<8x32xf32>
        %cst_54 = arith.constant dense<0.000000e+00> : vector<8xf32>
        %136 = vector.multi_reduction <add>, %135, %cst_54 [1] : vector<8x32xf32> to vector<8xf32>
        %137 = vector.shape_cast %136 : vector<8xf32> to vector<8x1xf32>
        %138 = math.sqrt %137 : vector<8x1xf32>
        %cst_55 = arith.constant 9.99999996E-13 : f32
        %139 = vector.broadcast %cst_55 : f32 to vector<8x1xf32>
        %140 = arith.maximumf %138, %139 : vector<8x1xf32>
        %141 = vector.broadcast %140 : vector<8x1xf32> to vector<8x32xf32>
        %142 = arith.divf %67, %141 : vector<8x32xf32>
        %143 = vector.broadcast %73 : vector<8x1xf32> to vector<8x32xf32>
        %144 = arith.mulf %142, %143 : vector<8x32xf32>
        %c0_56 = arith.constant 0 : index
        %c0_57 = arith.constant 0 : index
        %145 = vector.load %arg6[%c0_56, %c0_57] : memref<8x32xf32, #tpu.memory_space<vmem>>, vector<8x32xf32>
        tpu.vector_store %arg6[%c0_56, %c0_57], %144 {strides = array<i32>} : memref<8x32xf32, #tpu.memory_space<vmem>>, vector<8x32xf32>,
        %cst_58 = arith.constant 0.333333343 : f32
        %146 = vector.broadcast %cst_58 : f32 to vector<8x16xf32>
        %147 = arith.mulf %82, %146 : vector<8x16xf32>
        %148 = math.exp %147 : vector<8x16xf32>
        %cst_59 = arith.constant dense<0.000000e+00> : vector<8xf32>
        %149 = vector.multi_reduction <add>, %148, %cst_59 [1] : vector<8x16xf32> to vector<8xf32>
        %150 = vector.shape_cast %149 : vector<8xf32> to vector<8x1xf32>
        %151 = math.log %150 : vector<8x1xf32>
        %152 = vector.broadcast %151 : vector<8x1xf32> to vector<8x16xf32>
        %153 = arith.subf %147, %152 : vector<8x16xf32>
        %c0_60 = arith.constant 0 : index
        %c0_61 = arith.constant 0 : index
        %154 = vector.load %alloca_26[%c0_60, %c0_61] : memref<8x16xf32, #tpu.memory_space<vmem>>, vector<8x16xf32>
        %cst_62 = arith.constant 0.333333343 : f32
        %155 = vector.broadcast %cst_62 : f32 to vector<8x16xf32>
        %156 = arith.mulf %154, %155 : vector<8x16xf32>
        %cst_63 = arith.constant dense<0xFF800000> : vector<8xf32>
        %157 = vector.multi_reduction <maximumf>, %156, %cst_63 [1] : vector<8x16xf32> to vector<8xf32>
        %158 = vector.shape_cast %157 : vector<8xf32> to vector<8x1xf32>
        %159 = vector.broadcast %158 : vector<8x1xf32> to vector<8x16xf32>
        %160 = arith.subf %156, %159 : vector<8x16xf32>
        %161 = math.exp %160 : vector<8x16xf32>
        %cst_64 = arith.constant dense<0.000000e+00> : vector<8xf32>
        %162 = vector.multi_reduction <add>, %161, %cst_64 [1] : vector<8x16xf32> to vector<8xf32>
        %163 = vector.shape_cast %162 : vector<8xf32> to vector<8x1xf32>
        %164 = math.log %163 : vector<8x1xf32>
        %165 = vector.broadcast %164 : vector<8x1xf32> to vector<8x16xf32>
        %166 = arith.subf %160, %165 : vector<8x16xf32>
        %167 = vector.broadcast %163 : vector<8x1xf32> to vector<8x16xf32>
        %168 = arith.divf %161, %167 : vector<8x16xf32>
        %169 = vector.broadcast %73 : vector<8x1xf32> to vector<8x16xf32>
        %170 = arith.mulf %169, %168 : vector<8x16xf32>
        %171 = arith.subf %166, %153 : vector<8x16xf32>
        %172 = arith.mulf %170, %171 : vector<8x16xf32>
        %173 = vector.shape_cast %172 : vector<8x16xf32> to vector<1x8x16xf32>
        %cst_65 = arith.constant dense<0.000000e+00> : vector<1xf32>
        %174 = vector.multi_reduction <add>, %173, %cst_65 [1, 2] : vector<1x8x16xf32> to vector<1xf32>
        %175 = vector.shape_cast %174 : vector<1xf32> to vector<1x1x1xf32>
        %176 = vector.extract %175[0, 0, 0] : f32 from vector<1x1x1xf32>
        %cst_66 = arith.constant 8.000000e+00 : f32
        %177 = arith.divf %176, %cst_66 : f32
        %cst_67 = arith.constant 9.000000e+00 : f32
        %178 = arith.mulf %177, %cst_67 : f32
        %c2 = arith.constant 2 : index
        %179 = memref.load %arg8[%c2] : memref<8xf32, #tpu.memory_space<smem>>
        memref.store %178, %arg8[%c2] : memref<8xf32, #tpu.memory_space<smem>>
        tpu.yield
      }) : () -> ()
    } else {
    }
    %c8_i32 = arith.constant 8 : i32
    %3 = arith.muli %arg0, %c8_i32 : i32
    %4 = tpu.assume_multiple %3, 8 : i32
    %5 = arith.index_cast %4 : i32 to index
    %c0 = arith.constant 0 : index
    %6 = vector.load %arg6[%5, %c0] : memref<8x32xf32, #tpu.memory_space<vmem>>, vector<8x32xf32>
    %7 = arith.index_cast %4 : i32 to index
    %c0_1 = arith.constant 0 : index
    %8 = vector.load %arg7[%7, %c0_1] : memref<8x16xf32, #tpu.memory_space<vmem>>, vector<8x16xf32>
    %cst = arith.constant dense<0.000000e+00> : vector<8x8xf32>
    %9 = tpu.matmul %6, %6, %cst {dimension_numbers = #tpu.dot_dimension_numbers<[1], [1], [0], [0], [0, 0, 1, 0], [], []>} : vector<8x32xf32>, vector<8x32xf32>, vector<8x8xf32> -> vector<8x8xf32>
    %cst_2 = arith.constant dense<0.000000e+00> : vector<8x8xf32>
    %10 = tpu.matmul %8, %8, %cst_2 {dimension_numbers = #tpu.dot_dimension_numbers<[1], [1], [0], [0], [0, 0, 1, 0], [], []>} : vector<8x16xf32>, vector<8x16xf32>, vector<8x8xf32> -> vector<8x8xf32>
    %11 = arith.subf %9, %10 : vector<8x8xf32>
    %12 = tpu.iota {dimensions = array<i32: 0>} : vector<8x8xi32>
    %13 = tpu.iota {dimensions = array<i32: 1>} : vector<8x8xi32>
    %14 = arith.cmpi eq, %12, %13 : vector<8x8xi32>
    %cst_3 = arith.constant 0.000000e+00 : f32
    %15 = vector.broadcast %cst_3 : f32 to vector<8x8xf32>
    %16 = arith.select %14, %9, %15 : vector<8x8xi1>, vector<8x8xf32>
    %c3 = arith.constant 3 : index
    %17 = memref.load %arg8[%c3] : memref<8xf32, #tpu.memory_space<smem>>
    %18 = arith.mulf %9, %9 : vector<8x8xf32>
    %19 = vector.shape_cast %18 : vector<8x8xf32> to vector<1x8x8xf32>
    %cst_4 = arith.constant dense<0.000000e+00> : vector<1xf32>
    %20 = vector.multi_reduction <add>, %19, %cst_4 [1, 2] : vector<1x8x8xf32> to vector<1xf32>
    %21 = vector.shape_cast %20 : vector<1xf32> to vector<1x1x1xf32>
    %22 = vector.extract %21[0, 0, 0] : f32 from vector<1x1x1xf32>
    %23 = arith.addf %17, %22 : f32
    %c3_5 = arith.constant 3 : index
    %24 = memref.load %arg8[%c3_5] : memref<8xf32, #tpu.memory_space<smem>>
    memref.store %23, %arg8[%c3_5] : memref<8xf32, #tpu.memory_space<smem>>
    %c5 = arith.constant 5 : index
    %25 = memref.load %arg8[%c5] : memref<8xf32, #tpu.memory_space<smem>>
    %26 = arith.mulf %11, %11 : vector<8x8xf32>
    %27 = vector.shape_cast %26 : vector<8x8xf32> to vector<1x8x8xf32>
    %cst_6 = arith.constant dense<0.000000e+00> : vector<1xf32>
    %28 = vector.multi_reduction <add>, %27, %cst_6 [1, 2] : vector<1x8x8xf32> to vector<1xf32>
    %29 = vector.shape_cast %28 : vector<1xf32> to vector<1x1x1xf32>
    %30 = vector.extract %29[0, 0, 0] : f32 from vector<1x1x1xf32>
    %31 = arith.addf %25, %30 : f32
    %c5_7 = arith.constant 5 : index
    %32 = memref.load %arg8[%c5_7] : memref<8xf32, #tpu.memory_space<smem>>
    memref.store %31, %arg8[%c5_7] : memref<8xf32, #tpu.memory_space<smem>>
    %c6 = arith.constant 6 : index
    %33 = memref.load %arg8[%c6] : memref<8xf32, #tpu.memory_space<smem>>
    %34 = arith.mulf %16, %16 : vector<8x8xf32>
    %35 = vector.shape_cast %34 : vector<8x8xf32> to vector<1x8x8xf32>
    %cst_8 = arith.constant dense<0.000000e+00> : vector<1xf32>
    %36 = vector.multi_reduction <add>, %35, %cst_8 [1, 2] : vector<1x8x8xf32> to vector<1xf32>
    %37 = vector.shape_cast %36 : vector<1xf32> to vector<1x1x1xf32>
    %38 = vector.extract %37[0, 0, 0] : f32 from vector<1x1x1xf32>
    %39 = arith.addf %33, %38 : f32
    %c6_9 = arith.constant 6 : index
    %40 = memref.load %arg8[%c6_9] : memref<8xf32, #tpu.memory_space<smem>>
    memref.store %39, %arg8[%c6_9] : memref<8xf32, #tpu.memory_space<smem>>
    %c0_i32_10 = arith.constant 0 : i32
    %41 = arith.subi %arg0, %c0_i32_10 : i32
    %c1_i32 = arith.constant 1 : i32
    %c1_i32_11 = arith.constant 1 : i32
    %42 = arith.subi %c1_i32, %c1_i32_11 : i32
    %43 = arith.addi %41, %42 : i32
    %c1_i32_12 = arith.constant 1 : i32
    %44 = arith.divsi %43, %c1_i32_12 : i32
    %c1_i32_13 = arith.constant 1 : i32
    %c0_i32_14 = arith.constant 0 : i32
    %c0_i32_15 = arith.constant 0 : i32
    %45 = arith.subi %44, %c0_i32_15 : i32
    %46 = arith.addi %c0_i32_15, %45 : i32
    %c1_i32_16 = arith.constant 1 : i32
    scf.for %arg9 = %c0_i32_15 to %46 step %c1_i32_16  : i32 {
      %50 = arith.muli %arg9, %c1_i32_13 : i32
      %51 = arith.addi %c0_i32_14, %50 : i32
      %c8_i32_19 = arith.constant 8 : i32
      %52 = arith.muli %51, %c8_i32_19 : i32
      %53 = tpu.assume_multiple %52, 8 : i32
      %54 = arith.index_cast %53 : i32 to index
      %c0_20 = arith.constant 0 : index
      %55 = vector.load %arg6[%54, %c0_20] : memref<8x32xf32, #tpu.memory_space<vmem>>, vector<8x32xf32>
      %56 = arith.index_cast %53 : i32 to index
      %c0_21 = arith.constant 0 : index
      %57 = vector.load %arg7[%56, %c0_21] : memref<8x16xf32, #tpu.memory_space<vmem>>, vector<8x16xf32>
      %cst_22 = arith.constant dense<0.000000e+00> : vector<8x8xf32>
      %58 = tpu.matmul %6, %55, %cst_22 {dimension_numbers = #tpu.dot_dimension_numbers<[1], [1], [0], [0], [0, 0, 1, 0], [], []>} : vector<8x32xf32>, vector<8x32xf32>, vector<8x8xf32> -> vector<8x8xf32>
      %cst_23 = arith.constant dense<0.000000e+00> : vector<8x8xf32>
      %59 = tpu.matmul %8, %57, %cst_23 {dimension_numbers = #tpu.dot_dimension_numbers<[1], [1], [0], [0], [0, 0, 1, 0], [], []>} : vector<8x16xf32>, vector<8x16xf32>, vector<8x8xf32> -> vector<8x8xf32>
      %60 = arith.subf %58, %59 : vector<8x8xf32>
      %c3_24 = arith.constant 3 : index
      %61 = memref.load %arg8[%c3_24] : memref<8xf32, #tpu.memory_space<smem>>
      %62 = arith.mulf %58, %58 : vector<8x8xf32>
      %63 = vector.shape_cast %62 : vector<8x8xf32> to vector<1x8x8xf32>
      %cst_25 = arith.constant dense<0.000000e+00> : vector<1xf32>
      %64 = vector.multi_reduction <add>, %63, %cst_25 [1, 2] : vector<1x8x8xf32> to vector<1xf32>
      %65 = vector.shape_cast %64 : vector<1xf32> to vector<1x1x1xf32>
      %66 = vector.extract %65[0, 0, 0] : f32 from vector<1x1x1xf32>
      %cst_26 = arith.constant 2.000000e+00 : f32
      %67 = arith.mulf %cst_26, %66 : f32
      %68 = arith.addf %61, %67 : f32
      %c3_27 = arith.constant 3 : index
      %69 = memref.load %arg8[%c3_27] : memref<8xf32, #tpu.memory_space<smem>>
      memref.store %68, %arg8[%c3_27] : memref<8xf32, #tpu.memory_space<smem>>
      %c5_28 = arith.constant 5 : index
      %70 = memref.load %arg8[%c5_28] : memref<8xf32, #tpu.memory_space<smem>>
      %71 = arith.mulf %60, %60 : vector<8x8xf32>
      %72 = vector.shape_cast %71 : vector<8x8xf32> to vector<1x8x8xf32>
      %cst_29 = arith.constant dense<0.000000e+00> : vector<1xf32>
      %73 = vector.multi_reduction <add>, %72, %cst_29 [1, 2] : vector<1x8x8xf32> to vector<1xf32>
      %74 = vector.shape_cast %73 : vector<1xf32> to vector<1x1x1xf32>
      %75 = vector.extract %74[0, 0, 0] : f32 from vector<1x1x1xf32>
      %cst_30 = arith.constant 2.000000e+00 : f32
      %76 = arith.mulf %cst_30, %75 : f32
      %77 = arith.addf %70, %76 : f32
      %c5_31 = arith.constant 5 : index
      %78 = memref.load %arg8[%c5_31] : memref<8xf32, #tpu.memory_space<smem>>
      memref.store %77, %arg8[%c5_31] : memref<8xf32, #tpu.memory_space<smem>>
    }
    %c0_i32_17 = arith.constant 0 : i32
    %47 = arith.cmpi eq, %arg0, %c0_i32_17 : i32
    %48 = arith.extui %47 : i1 to i32
    %c0_i32_18 = arith.constant 0 : i32
    %49 = arith.cmpi ne, %48, %c0_i32_18 : i32
    scf.if %49 {
      %c1 = arith.constant 1 : index
      %50 = memref.load %arg8[%c1] : memref<8xf32, #tpu.memory_space<smem>>
      %c2 = arith.constant 2 : index
      %51 = memref.load %arg8[%c2] : memref<8xf32, #tpu.memory_space<smem>>
      %c4 = arith.constant 4 : index
      %52 = memref.load %arg8[%c4] : memref<8xf32, #tpu.memory_space<smem>>
      %c3_19 = arith.constant 3 : index
      %53 = memref.load %arg8[%c3_19] : memref<8xf32, #tpu.memory_space<smem>>
      %c6_20 = arith.constant 6 : index
      %54 = memref.load %arg8[%c6_20] : memref<8xf32, #tpu.memory_space<smem>>
      %55 = arith.subf %53, %54 : f32
      %cst_21 = arith.constant 5.600000e+01 : f32
      %56 = arith.divf %55, %cst_21 : f32
      %c5_22 = arith.constant 5 : index
      %57 = memref.load %arg8[%c5_22] : memref<8xf32, #tpu.memory_space<smem>>
      %cst_23 = arith.constant 6.400000e+01 : f32
      %58 = arith.divf %57, %cst_23 : f32
      %cst_24 = arith.constant 3.000000e-01 : f32
      %59 = arith.mulf %cst_24, %51 : f32
      %60 = arith.addf %50, %59 : f32
      %cst_25 = arith.constant 2.000000e-01 : f32
      %61 = arith.mulf %cst_25, %56 : f32
      %62 = arith.addf %60, %61 : f32
      %cst_26 = arith.constant 1.000000e-01 : f32
      %63 = arith.mulf %cst_26, %52 : f32
      %64 = arith.addf %62, %63 : f32
      %cst_27 = arith.constant 1.500000e-01 : f32
      %65 = arith.mulf %cst_27, %58 : f32
      %66 = arith.addf %64, %65 : f32
      %c0_28 = arith.constant 0 : index
      %67 = memref.load %arg5[%c0_28] : memref<8xf32, #tpu.memory_space<smem>>
      memref.store %66, %arg5[%c0_28] : memref<8xf32, #tpu.memory_space<smem>>
      %c1_29 = arith.constant 1 : index
      %68 = memref.load %arg5[%c1_29] : memref<8xf32, #tpu.memory_space<smem>>
      memref.store %50, %arg5[%c1_29] : memref<8xf32, #tpu.memory_space<smem>>
      %c2_30 = arith.constant 2 : index
      %69 = memref.load %arg5[%c2_30] : memref<8xf32, #tpu.memory_space<smem>>
      memref.store %51, %arg5[%c2_30] : memref<8xf32, #tpu.memory_space<smem>>
      %c3_31 = arith.constant 3 : index
      %70 = memref.load %arg5[%c3_31] : memref<8xf32, #tpu.memory_space<smem>>
      memref.store %56, %arg5[%c3_31] : memref<8xf32, #tpu.memory_space<smem>>
      %c4_32 = arith.constant 4 : index
      %71 = memref.load %arg5[%c4_32] : memref<8xf32, #tpu.memory_space<smem>>
      memref.store %52, %arg5[%c4_32] : memref<8xf32, #tpu.memory_space<smem>>
      %c5_33 = arith.constant 5 : index
      %72 = memref.load %arg5[%c5_33] : memref<8xf32, #tpu.memory_space<smem>>
      memref.store %58, %arg5[%c5_33] : memref<8xf32, #tpu.memory_space<smem>>
      %cst_34 = arith.constant 0.000000e+00 : f32
      %c6_35 = arith.constant 6 : index
      %73 = memref.load %arg5[%c6_35] : memref<8xf32, #tpu.memory_space<smem>>
      memref.store %cst_34, %arg5[%c6_35] : memref<8xf32, #tpu.memory_space<smem>>
      %cst_36 = arith.constant 0.000000e+00 : f32
      %c7 = arith.constant 7 : index
      %74 = memref.load %arg5[%c7] : memref<8xf32, #tpu.memory_space<smem>>
      memref.store %cst_36, %arg5[%c7] : memref<8xf32, #tpu.memory_space<smem>>
    } else {
    }
    return
  }
  func.func @transform_2(%arg0: i32) -> (i32, i32) {
    %c0_i32 = arith.constant 0 : i32
    %c0_i32_0 = arith.constant 0 : i32
    %c0_i32_1 = arith.constant 0 : i32
    return %c0_i32, %c0_i32_0 : i32, i32
  }
  func.func @transform_4(%arg0: i32) -> i32 {
    %c0_i32 = arith.constant 0 : i32
    %c0_i32_0 = arith.constant 0 : i32
    return %c0_i32 : i32
  }
}

</mosaic_0001>

<bundles_post_ra>
// kernel: tpu_custom_call.1
= control target key start
LH: loop header
LB: loop body
LE: loop exit
PB: predicated region body
PF: predicated region fallthrough
CT: control target
= control target key end

     0   :  { %9 = vsyncpa [#allocation6], 0  ;;  %s973_s0 = inlined_call_operand.vmem [shape: f32[8,16], index: 0, kind: input, shape index: {}]   ;;  %s974_s1 = inlined_call_operand.hbm [shape: f32[8,32], index: 1, kind: input, shape index: {}]   ;;  %s975_s2 = inlined_call_operand.vmem [shape: s32[8,1], index: 2, kind: input, shape index: {}]   ;;  %s976_s3 = inlined_call_operand.vmem [shape: f32[8,16], index: 3, kind: input, shape index: {}]   ;;  %s977_s4 = inlined_call_operand.hbm [shape: f32[8], index: 4, kind: output, shape index: {}]  }
   0x1   :  { %v54_v0 = vld [vmem:[%s973_s0] sm:$0xff] }
   0x2   :  { %63 = vsyncadd [#allocation10], 128  ;;  %v109_v1 = vld [vmem:[%s976_s3] sm:$0xff]  ;;  %s863_s19 = smov [#allocation8]   ;;  %s823_s23 = scalar_lea.hbm %s974_s1, 128 }
   0x3   :  { %s72_s20 = sshll.u32 %s863_s19, 4  ;;  %p824_p0 = scmp.ne.s32.totalorder %s974_s1, %s823_s23  ;;  %s73_s20 = int_to_ptr.vmem [resolvable:$true] %s72_s20 }
   0x4   :  { %p827_p1 = scmp.lt.u32.totalorder %s823_s23, %s974_s1 }
   0x6   :  { %p829_p2 = pnand %p827_p1, %p824_p0 }
   0x8   :  { %832 = shalt.err (!%p829_p2)  }
   0x9   :  { %s833_s0 = scalar_lea.vmem %s73_s20, 128  ;;  %p838_p4 = scmp.lt.s32.totalorder %s73_s20, %s73_s20 }
   0xa   :  { %p834_p3 = scmp.ne.s32.totalorder %s73_s20, %s833_s0  ;;  %p839_p5 = scmp.lt.s32.totalorder %s833_s0, %s833_s0 }
   0xc   :  { %p840_p6 = por %p839_p5, %p838_p4 }
   0xe   :  { %p841_p7 = pnand %p840_p6, %p834_p3 }
  0x10   :  { %844 = shalt.err (!%p841_p7)  }
  0x11   :  { %75 = dma.hbm_to_vmem [thread:$0]  %s974_s1, 128, %s73_s20, [#allocation10 + $0x1] }
  0x12   :  { %118 = vsyncadd [#allocation10 + $0x2], 128 }
  0x13   :  { %855 = dma.done.wait [#allocation10], 128 }
  0x14   :  { %856 = vsyncadd [#allocation10], 4294967168 }
  0x15   :  { %857 = dma.done.wait [#allocation10 + $0x1], 128 }
  0x16   :  { %858 = vsyncadd [#allocation10 + $0x1], 4294967168  ;;  %vm142_vm0 = vcmask 130048   ;;  %v251_v2 = vmul.f32 0.33333334, %v109_v1 }
  0x17   :  { %859 = dma.done.wait [#allocation10 + $0x2], 128 }
  0x18   :  { %860 = vsyncadd [#allocation10 + $0x2], 4294967168  ;;  %v143_v3 = vsel %vm142_vm0, %v54_v0, -inf  ;;  %v252_v4 = vsel %vm142_vm0, %v251_v2, -inf  ;;  %v864_v5 = vmov 0   ;;  %v134_v6 = vlaneseq  ;;  %v128_v26 = vld [vmem:[%s975_s2] sm:$0xff] }
  0x19   :  { %144 = vmax.xlane.f32.xlu0 %v143_v3  ;;  %801 = vset.pattern.permute.xlu1 %v864_v5  ;;  %v865_v34 = vmov 0.0   ;;  %vm208_vm5 = vcmask 7168   ;;  %vm225_vm6 = vcmask 261120   ;;  %vm867_vm9 = vmmov 0   ;;  %s868_s11 = smov 0.0   ;;  %s845_s0 = scalar_lea.hbm %s977_s4, 16 }
  0x1a   :  { %802 = vset.pattern.permute.xlu0 %v864_v5  ;;  %v916_v7 = vand.u32 127, %v134_v6  ;;  %vm447_vm11 = vcmask 64512   ;;  %716 = sst [smem:[#allocation5 + $0x6]] %s868_s11  ;;  %p846_p8 = scmp.ne.s32.totalorder %s977_s4, %s845_s0 }
  0x1b   :  { %718 = sst [smem:[#allocation5 + $0x7]] %s868_s11  ;;  %p849_p9 = scmp.lt.u32.totalorder %s845_s0, %s977_s4 }
  0x1d   :  { %253 = vmax.xlane.f32.xlu0 %v252_v4  ;;  %v127_v4 = vld [vmem:[#allocation8] sm:$0xff]  ;;  %p851_p10 = pnand %p849_p9, %p846_p8 }
  0xa6   :  { %v145_v8 = vpop.xlane.xlu0 %144 }
  0xa7   :  { %v146_v9 = vsub.f32 %v54_v0, %v145_v8  ;;  %vm180_vm1 = vcmp.eq.f32.partialorder %v54_v0, %v145_v8 }
  0xa8   :  { %v181_v10 = vsel %vm180_vm1, %v916_v7, 16 }
  0xa9   :  { %v147_v11 = vmul.f32 1.442695, %v146_v9  ;;  %v919_v12 = vmul.f32 0.33333334, %v146_v9  ;;  %v182_v13 = vsel %vm142_vm0, %v181_v10, 2147483647 }
  0xaa   :  { %v254_v14 = vpop.xlane.xlu0 %253  ;;  %v184_v15 = vshra.s32 %v182_v13, 16  ;;  %v183_v27 = vand.u32 65535, %v182_v13 }
  0xab   :  { %803 = vpow2.f32 %v147_v11  ;;  %v242_v16 = vmul.f32 1.442695, %v919_v12  ;;  %v923_v17 = vsub.f32 %v251_v2, %v254_v14 }
  0xac   :  { %v186_v18 = vcvt.s32.f32 %v184_v15  ;;  %v185_v29 = vcvt.s32.f32 %v183_v27 }
  0xad   :  { %805 = vpow2.f32 %v242_v16  ;;  %v256_v19 = vmul.f32 1.442695, %v923_v17 }
  0xae   :  { %187 = vmin.xlane.f32.xlu1 %v186_v18 }
  0xaf   :  { %807 = vpow2.f32 %v256_v19 }
  0xb5   :  { %v804_v20 = vpop.eup %803 }
  0xb6   :  { %v149_v21 = vsel %vm142_vm0, %v804_v20, 0.0 }
  0xb7   :  { %v806_v22 = vpop.eup %805  ;;  %150 = vadd.xlane.f32.xlu1 %v149_v21 }
  0xb8   :  { %v244_v23 = vsel %vm142_vm0, %v806_v22, 0.0 }
  0xb9   :  { %v808_v24 = vpop.eup %807  ;;  %245 = vadd.xlane.f32.xlu0 %v244_v23 }
  0xba   :  { %v258_v25 = vsel %vm142_vm0, %v808_v24, 0.0 }
  0xbb   :  { %259 = vadd.xlane.f32.xlu1 %v258_v25 }
  0xcc   :  { %137 = vperm.xlu1 %801, %v128_v26  }
 0x13b   :  { %v188_v28 = vpop.xlane.xlu1 %187 }
 0x13c   :  { %vm189_vm2 = vcmp.eq.f32.partialorder %v186_v18, %v188_v28  ;;  %v194_v46 = vcvt.f32.s32 %v188_v28 }
 0x13d   :  { %v190_v30 = vsel %vm189_vm2, %v185_v29, inf }
 0x13e   :  { %191 = vmin.xlane.f32.xlu0 %v190_v30  ;;  %v195_v50 = vshll.u32 %v194_v46, 16 }
 0x144   :  { %v151_v31 = vpop.xlane.xlu1 %150 }
 0x145   :  { %809 = vlog2.f32 %v151_v31 }
 0x146   :  { %811 = vrcp.f32 %v151_v31  ;;  %v246_v45 = vpop.xlane.xlu0 %245 }
 0x148   :  { %v260_v32 = vpop.xlane.xlu1 %259 }
 0x149   :  { %813 = vlog2.f32 %v260_v32 }
 0x14a   :  { %815 = vlog2.f32 %v246_v45  ;;  %v440_v45 = vshrl.u32 %v134_v6, 7 }
 0x14b   :  { %817 = vrcp.f32 %v260_v32 }
 0x14c   :  { %v138_v33 = vpop.permute.xlu1 %137  ;;  %vm443_vm10 = vcmp.eq.s32.totalorder %v440_v45, %v916_v7 }
 0x14d   :  { %vm139_vm3 = vcmp.eq.s32.totalorder %v916_v7, %v138_v33 }
 0x14e   :  { %v752_v35 = vsel %vm139_vm3, 1.0, %v865_v34 }
 0x14f   :  { %v810_v36 = vpop.eup %809  ;;  %v160_v37 = vmul.f32 0.8933333, %v752_v35 }
 0x150   :  { %v812_v38 = vpop.eup %811  ;;  %v153_v39 = vmul.f32 0.6931472, %v810_v36 }
 0x151   :  { %v157_v40 = vmul.f32 %v812_v38, %v804_v20  ;;  %v161_v41 = vadd.f32 0.006666667, %v160_v37  ;;  %v754_v53 = vadd.f32 -0.8, %v812_v38  ;;  %v204_v62 = vmul.f32 %v812_v38, %v812_v38 }
 0x152   :  { %v154_v42 = vsub.f32 %v146_v9, %v153_v39  ;;  %v224_v9 = vmul.f32 %v127_v4, %v127_v4 }
 0x153   :  { %159 = vst.msk [vmem:[#allocation3] sm:$0xff] %vm142_vm0, %v157_v40  ;;  %v814_v47 = vpop.eup %813  ;;  %v201_v56 = vmul.f32 %v754_v53, %v754_v53 }
 0x154   :  { %v163_v43 = vmul.f32 %v161_v41, %v154_v42  ;;  %v816_v48 = vpop.eup %815  ;;  %v262_v51 = vmul.f32 0.6931472, %v814_v47  ;;  %v226_v11 = vsel %vm225_vm6, %v224_v9, 0.0 }
 0x155   :  { %v248_v54 = vmul.f32 0.6931472, %v816_v48  ;;  %v818_v63 = vpop.eup %817 }
 0x156   :  { %v164_v44 = vsel %vm142_vm0, %v163_v43, 0.0  ;;  %v263_v57 = vsub.f32 %v923_v17, %v262_v51  ;;  %v265_v3 = vmul.f32 %v818_v63, %v808_v24 }
 0x157   :  { %165 = vadd.xlane.f32.xlu0 %v164_v44  ;;  %v249_v59 = vsub.f32 %v919_v12, %v248_v54  ;;  %v866_v44 = vmov 0.0  }
 0x158   :  { %772 = vmatprep.subr.mxu0 %v866_v44  ;;  %777 = vmatprep.subr.mxu1 %v866_v44 }
 0x159   :  { %v267_v1 = vsub.f32 %v263_v57, %v249_v59  ;;  %774 = vmatprep.mubr.msk.f32.mxu0 %vm867_vm9, %v866_v44  ;;  %779 = vmatprep.mubr.msk.f32.mxu1 %vm867_vm9, %v866_v44 }
 0x15a   :  { %v289_v43 = vld [vmem:[#allocation3] sm:$0xff] }
 0x15b   :  { %v268_v8 = vmul.f32 %v267_v1, %v265_v3  ;;  %778 = vmatpush3.xpose.msk.msra.mxu1 %vm142_vm0, %v289_v43 }
 0x15d   :  { %v269_v10 = vsel %vm142_vm0, %v268_v8, 0.0 }
 0x15e   :  { %780 = vmatmul.mubr.msk.f32.vlgmr.msra.gmra.mrb[0].mxu1 %vm142_vm0, %v289_v43 }
 0x1cb   :  { %v192_v49 = vpop.xlane.xlu0 %191 }
 0x1cc   :  { %v193_v52 = vcvt.f32.s32 %v192_v49 }
 0x1ce   :  { %v196_v55 = vadd.s32 %v195_v50, %v193_v52 }
 0x1d0   :  { %vm197_vm4 = vcmp.eq.s32.totalorder %v196_v55, %v128_v26 }
 0x1d1   :  { %v753_v58 = vsel %vm197_vm4, 1.0, %v865_v34 }
 0x1d2   :  { %v202_v60 = vmul.f32 %v753_v58, %v201_v56  ;;  %v203_v61 = vsub.f32 1.0, %v753_v58 }
 0x1d4   :  { %v205_v0 = vmul.f32 %v204_v62, %v203_v61 }
 0x1d6   :  { %v206_v2 = vadd.f32 %v205_v0, %v202_v60 }
 0x1d8   :  { %v209_v5 = vsel %vm208_vm5, %v206_v2, 0.0 }
 0x1d9   :  { %210 = vadd.xlane.f32.xlu0 %v209_v5 }
 0x1dd   :  { %270 = vadd.xlane.f32.xlu0 %v269_v10 }
 0x1e1   :  { %227 = vadd.xlane.f32.xlu0 %v226_v11 }
 0x1e4   :  { %v166_v12 = vpop.xlane.xlu0 %165 }
 0x1e5   :  { %v167_v13 = vrot.slane %v166_v12, 4 }
 0x1e7   :  { %v168_v14 = vadd.f32 %v167_v13, %v166_v12 }
 0x1e9   :  { %v169_v15 = vrot.slane %v168_v14, 2 }
 0x1eb   :  { %v170_v16 = vadd.f32 %v169_v15, %v168_v14 }
 0x1ed   :  { %v171_v17 = vrot.slane %v170_v16, 1 }
 0x1ef   :  { %v172_v18 = vadd.f32 %v171_v17, %v170_v16 }
 0x1f1   :  { %782 = vpush %v172_v18 }
 0x222   :  { %s783_s2 = spop %782 }
 0x223   :  { %s174_s30 = ssub.f32 0.0, %s783_s2 }
 0x225   :  { %s939_s5 = smul.f32 0.125, %s174_s30 }
 0x227   :  { %706 = sst [smem:[#allocation5 + $0x1]] %s939_s5 }
 0x231   :  { %v434_v47 = vpop.f32.mrb[0].mxu1 }
 0x232   :  { %v781_v50 = vpop.f32.mrb[1].mxu1 }
 0x266   :  { %v211_v19 = vpop.xlane.xlu0 %210 }
 0x267   :  { %v212_v20 = vrot.slane %v211_v19, 4 }
 0x269   :  { %v213_v21 = vadd.f32 %v212_v20, %v211_v19 }
 0x26a   :  { %v271_v22 = vpop.xlane.xlu0 %270 }
 0x26b   :  { %v214_v23 = vrot.slane %v213_v21, 2  ;;  %v272_v24 = vrot.slane %v271_v22, 4 }
 0x26d   :  { %v273_v25 = vadd.f32 %v272_v24, %v271_v22  ;;  %v215_v26 = vadd.f32 %v214_v23, %v213_v21 }
 0x26e   :  { %v228_v27 = vpop.xlane.xlu0 %227 }
 0x26f   :  { %v274_v28 = vrot.slane %v273_v25, 2  ;;  %v216_v29 = vrot.slane %v215_v26, 1  ;;  %819 = vrsqrt.f32 %v228_v27  ;;  %vm231_vm7 = vcmp.eq.f32.partialorder %v228_v27, inf }
 0x270   :  { %v234_v35 = vand.u32 2147483648, %v228_v27  ;;  %vm233_vm8 = vcmp.eq.f32.partialorder %v228_v27, 0.0 }
 0x271   :  { %v217_v30 = vadd.f32 %v216_v29, %v215_v26  ;;  %v275_v31 = vadd.f32 %v274_v28, %v273_v25 }
 0x273   :  { %784 = vpush %v217_v30  ;;  %v276_v32 = vrot.slane %v275_v31, 1 }
 0x275   :  { %v277_v33 = vadd.f32 %v276_v32, %v275_v31 }
 0x277   :  { %786 = vpush %v277_v33 }
 0x279   :  { %v820_v34 = vpop.eup %819 }
 0x27a   :  { %v230_v36 = vmul.f32 %v820_v34, %v228_v27 }
 0x27c   :  { %v232_v37 = vsel %vm231_vm7, %v228_v27, %v230_v36 }
 0x27d   :  { %v235_v38 = vsel %vm233_vm8, %v234_v35, %v232_v37 }
 0x27e   :  { %v236_v39 = vmax.f32 %v235_v38, 1e-12 }
 0x280   :  { %821 = vrcp.f32 %v236_v39 }
 0x28a   :  { %v822_v40 = vpop.eup %821 }
 0x28b   :  { %v238_v41 = vmul.f32 %v822_v40, %v127_v4 }
 0x28d   :  { %240 = vst.msk [vmem:[#allocation2] sm:$0xff] %vm225_vm6, %v238_v41 }
 0x294   :  { %v287_v42 = vld [vmem:[#allocation2] sm:$0xff] }
 0x295   :  { %773 = vmatpush3.xpose.msk.msra.mxu0 %vm225_vm6, %v287_v42 }
 0x298   :  { %775 = vmatmul.mubr.msk.f32.vlgmr.msra.gmra.mrb[0].mxu0 %vm225_vm6, %v287_v42 }
 0x2a4   :  { %s942_s6 = spop %784 }
 0x2a5   :  { %s221_s7 = smul.f32 0.125, %s942_s6 }
 0x2a7   :  { %712 = sst [smem:[#allocation5 + $0x4]] %s221_s7  ;;  %s699_s20 = smul.f32 0.1, %s221_s7 }
 0x2a8   :  { %s787_s8 = spop %786 }
 0x2a9   :  { %s281_s9 = smul.f32 0.125, %s787_s8 }
 0x2ab   :  { %s945_s10 = smul.f32 9.0, %s281_s9 }
 0x2ad   :  { %708 = sst [smem:[#allocation5 + $0x2]] %s945_s10  ;;  %s695_s14 = smul.f32 0.3, %s945_s10 }
 0x2af   :  { %s696_s19 = sadd.f32 %s695_s14, %s939_s5 }
 0x36b   :  { %v360_v46 = vpop.f32.mrb[0].mxu0 }
 0x36c   :  { %v438_v48 = vsub.f32 %v360_v46, %v434_v47  ;;  %v776_v49 = vpop.f32.mrb[1].mxu0  ;;  %v446_v51 = vmul.f32 %v360_v46, %v360_v46  ;;  %v444_v52 = vsel %vm443_vm10, %v360_v46, 0.0 }
 0x36d   :  { %v477_v53 = vmul.f32 %v444_v52, %v444_v52 }
 0x36e   :  { %v462_v54 = vmul.f32 %v438_v48, %v438_v48  ;;  %v448_v55 = vsel %vm447_vm11, %v446_v51, 0.0 }
 0x36f   :  { %449 = vadd.xlane.f32.xlu0 %v448_v55  ;;  %v478_v56 = vsel %vm447_vm11, %v477_v53, 0.0 }
 0x370   :  { %479 = vadd.xlane.f32.xlu1 %v478_v56  ;;  %v463_v57 = vsel %vm447_vm11, %v462_v54, 0.0 }
 0x373   :  { %464 = vadd.xlane.f32.xlu0 %v463_v57 }
 0x3fc   :  { %v450_v6 = vpop.xlane.xlu0 %449 }
 0x3fd   :  { %v451_v7 = vrot.slane %v450_v6, 4  ;;  %v480_v58 = vpop.xlane.xlu1 %479 }
 0x3fe   :  { %v481_v59 = vrot.slane %v480_v58, 4 }
 0x3ff   :  { %v452_v60 = vadd.f32 %v451_v7, %v450_v6 }
 0x400   :  { %v482_v61 = vadd.f32 %v481_v59, %v480_v58  ;;  %v465_v62 = vpop.xlane.xlu0 %464 }
 0x401   :  { %v453_v63 = vrot.slane %v452_v60, 2  ;;  %v466_v0 = vrot.slane %v465_v62, 4 }
 0x402   :  { %v483_v1 = vrot.slane %v482_v61, 2 }
 0x403   :  { %v467_v2 = vadd.f32 %v466_v0, %v465_v62  ;;  %v454_v3 = vadd.f32 %v453_v63, %v452_v60 }
 0x404   :  { %v484_v4 = vadd.f32 %v483_v1, %v482_v61 }
 0x405   :  { %v468_v5 = vrot.slane %v467_v2, 2  ;;  %v455_v8 = vrot.slane %v454_v3, 1 }
 0x406   :  { %v485_v11 = vrot.slane %v484_v4, 1 }
 0x407   :  { %v469_v9 = vadd.f32 %v468_v5, %v467_v2  ;;  %v456_v10 = vadd.f32 %v455_v8, %v454_v3 }
 0x408   :  { %v486_v14 = vadd.f32 %v485_v11, %v484_v4 }
 0x409   :  { %788 = vpush %v456_v10  ;;  %v470_v12 = vrot.slane %v469_v9, 1 }
 0x40b   :  { %v471_v13 = vadd.f32 %v470_v12, %v469_v9 }
 0x40d   :  { %790 = vpush %v471_v13 }
 0x40e   :  { %792 = vpush %v486_v14 }
 0x43a   :  { %s789_s12 = spop %788 }
 0x43e   :  { %s791_s13 = spop %790 }
 0x43f   :  { %s694_s15 = smul.f32 0.015625, %s791_s13  ;;  %s793_s16 = spop %792 }
 0x440   :  { %s687_s17 = ssub.f32 %s789_s12, %s793_s16 }
 0x441   :  { %714 = sst [smem:[#allocation5 + $0x5]] %s694_s15  ;;  %s701_s23 = smul.f32 0.15, %s694_s15 }
 0x442   :  { %s690_s18 = smul.f32 0.017857144, %s687_s17 }
 0x444   :  { %s697_s21 = smul.f32 0.2, %s690_s18  ;;  %710 = sst [smem:[#allocation5 + $0x3]] %s690_s18 }
 0x446   :  { %s698_s22 = sadd.f32 %s697_s21, %s696_s19 }
 0x448   :  { %s700_s24 = sadd.f32 %s699_s20, %s698_s22 }
 0x44a   :  { %s702_s25 = sadd.f32 %s701_s23, %s700_s24 }
 0x44c   :  { %704 = sst [smem:[#allocation5]] %s702_s25 }
 0x44d   :  { %854 = shalt.err (!%p851_p10)
}
 0x44e   :  { %s869_s2 = smov [#allocation5]  }
 0x44f   :  { %726 = dma.smem_to_hbm %s869_s2, 16, %s977_s4, [#allocation6]  }
 0x450   :  { %861 = dma.done.wait [#allocation6], 16  }
 0x451   :  { %862 = vsyncadd [#allocation6], 4294967280 }
 0x452   :  { %730 = sfence }
 0x453   :  { %731 = vsyncpa [#allocation6], 1 }

</bundles_post_ra>
